<compile_context>
chip_gen: v7x
topology: tpu7x:2x2x1
jax: 0.10.0
libtpu: 0.0.40
codegen_flags: <defaults>
</compile_context>

<pallas_src>
import jax
import jax.numpy as jnp
from jax.experimental import pallas as pl
from jax.experimental.pallas import tpu as pltpu

BN_EPS = 1e-5  # PyTorch BatchNorm1d default


# ----------------------------- fused Pallas kernel -------------------------- #

def make_fused_kernel(L_out, C_out, NP, B2):
    def kernel(p_ref, wc_ref, bc_ref, w1_ref, b1_ref, w2_ref, b2_ref, o_ref):
        # p_ref : (L_out*NP, CKp)  l-major im2col patches, batch padded to NP sublanes
        # wc_ref: (CKp, C_out)     conv weight (im2col columns) with BN scale folded in
        # bc_ref: (1, C_out)       folded BN shift (beta - mu*scale)
        # w1_ref: (L_out*C_out, E) linear1 weight, BN-folded, permuted to (l, c) row order
        # b1_ref: (1, E)           folded linear1 bias + BN shift
        # w2_ref: (E, num_classes), b2_ref: (1, num_classes)

        # conv + BN + ReLU for every output position in ONE MXU pass.
        y = jnp.dot(p_ref[...], wc_ref[...], preferred_element_type=jnp.float32)
        y = jnp.maximum(y + bc_ref[...], 0.0)                       # (L_out*NP, C_out)

        E = w1_ref.shape[1]
        h = jnp.zeros((NP, E), jnp.float32)
        # linear1 consumed position-by-position: each slice of y is an aligned
        # 8-sublane window, each weight slice a static 64-row window — the conv
        # activation never leaves the kernel (no HBM traffic, no narrow stores).
        for l in range(L_out):
            y_l = y[l * NP:(l + 1) * NP, :]                         # (NP, C_out)
            w1_l = w1_ref[l * C_out:(l + 1) * C_out, :]             # (C_out, E)
            h = h + jnp.dot(y_l, w1_l, preferred_element_type=jnp.float32)

        h = jnp.maximum(h + b1_ref[...], 0.0)                       # linear1 + BN + ReLU
        # TODO(synk): nn.Dropout runs in eval mode (identity); PyTorch's stochastic
        # drop mask / RNG stream has no exact Pallas equivalent.
        out = jnp.dot(h, w2_ref[...], preferred_element_type=jnp.float32) + b2_ref[...]
        o_ref[...] = out[:B2, :]                                    # drop batch padding
    return kernel


# ----------------------------- weight preparation --------------------------- #

def prepare_params(conv_w, w1, b1, w2, b2, gamma, beta, mean, var):
    """One-time prep: fold eval-mode BN into weights, permute w1 to kill the
    activation transpose, pad the im2col contraction dim to a multiple of 256."""
    C_out, C_in, K = conv_w.shape
    E, hidden = w1.shape
    L_out = hidden // C_out
    assert hidden == C_out * L_out
    assert E == C_out, "module reuses self.batchnorm: embedding_dim must equal input_dim"

    CK = C_in * K
    CKp = ((CK + 255) // 256) * 256               # 180 -> 256: one unmasked MXU pass

    scale = gamma * jax.lax.rsqrt(var + BN_EPS)   # shared BN (used after conv AND linear1)

    # conv weight -> im2col column matrix, BN scale folded, contraction rows zero-padded
    wc = conv_w.reshape(C_out, CK).T * scale[None, :]
    wc = jnp.pad(wc, ((0, CKp - CK), (0, 0)))                     # (CKp, C_out)
    bc = (beta - mean * scale).reshape(1, C_out)                  # folded BN shift

    # linear1: fold BN on the output dim; permute columns so row index = l*C_out + c,
    # i.e. the kernel consumes the conv output in natural (l, c) order.
    w1f = w1 * scale[:, None]
    w1r = (w1f.reshape(E, C_out, L_out)
              .transpose(2, 1, 0)
              .reshape(L_out * C_out, E))                         # (L_out*C_out, E)
    b1f = ((b1 - mean) * scale + beta).reshape(1, E)

    w2t = w2.T                                                    # (E, num_classes)
    b2r = b2.reshape(1, -1)

    cfg = dict(L_out=int(L_out), C_out=int(C_out), CK=int(CK), CKp=int(CKp),
               K=int(K), stride=2, pad=7)
    params = dict(wc=wc, bc=bc, w1r=w1r, b1f=b1f, w2t=w2t, b2r=b2r)
    return params, cfg


# --------------------------------- forward ---------------------------------- #

def build_forward(cfg):
    L_out, C_out = cfg["L_out"], cfg["C_out"]
    CK, CKp, K = cfg["CK"], cfg["CKp"], cfg["K"]
    stride, pad = cfg["stride"], cfg["pad"]

    def forward(x1, x2, wc, bc, w1r, b1f, w2t, b2r):
        # Single im2col chain on the concatenated input (tiny array, done in XLA),
        # emitted l-major with the batch dim zero-padded to a full 8-sublane group
        # per position so every in-kernel slice is vreg-aligned.
        x = jnp.concatenate([x1, x2], axis=0)                     # (2B, C_in, L)
        B2, C_in, L = x.shape
        NP = ((B2 + 7) // 8) * 8                                  # batch rows per position
        xp = jnp.pad(x, ((0, 0), (0, 0), (pad, pad)))
        idx = jnp.arange(L_out)[:, None] * stride + jnp.arange(K)[None, :]   # (L_out, K)
        patches = xp[:, :, idx]                                   # (2B, C_in, L_out, K)
        patches = patches.transpose(2, 0, 1, 3).reshape(L_out, B2, CK)       # l-major
        patches = jnp.pad(patches, ((0, 0), (0, NP - B2), (0, CKp - CK)))
        patches = patches.reshape(L_out * NP, CKp)                # lane-dense (64, 256)

        num_classes = w2t.shape[1]
        kernel = make_fused_kernel(L_out, C_out, NP, B2)
        full = lambda s: pl.BlockSpec(s, lambda i: (0,) * len(s))
        return pl.pallas_call(
            kernel,
            out_shape=jax.ShapeDtypeStruct((B2, num_classes), jnp.float32),
            grid=(1,),
            in_specs=[full(patches.shape), full(wc.shape), full(bc.shape),
                      full(w1r.shape), full(b1f.shape),
                      full(w2t.shape), full(b2r.shape)],
            out_specs=full((B2, num_classes)),
            compiler_params=pltpu.CompilerParams(
                dimension_semantics=("arbitrary",)),
        )(patches, wc, bc, w1r, b1f, w2t, b2r)

    return jax.jit(forward)


# ------------------------------ pure-JAX reference -------------------------- #

def ref_forward(x1, x2, conv_w, w1, b1, w2, b2, g, bt, mu, var):
    def conv_bn_relu(x):
        y = jax.lax.conv_general_dilated(
            x, conv_w, window_strides=(2,), padding=((7, 7),),
            dimension_numbers=("NCH", "OIH", "NCH"))
        z = ((y - mu[None, :, None]) * jax.lax.rsqrt(var[None, :, None] + BN_EPS)
             * g[None, :, None] + bt[None, :, None])
        return jnp.maximum(z, 0.0)

    y1, y2 = conv_bn_relu(x1), conv_bn_relu(x2)
    x = jnp.concatenate([y1.reshape(y1.shape[0], -1),
                         y2.reshape(y2.shape[0], -1)], axis=0)
    h = x @ w1.T + b1
    h = (h - mu) * jax.lax.rsqrt(var + BN_EPS) * g + bt
    h = jnp.maximum(h, 0.0)
    return h @ w2.T + b2


# ----------------------------------- main ------------------------------------ #

if __name__ == "__main__":
    B, C_in, L = 2, 12, 16
    C_out, K = 64, 15                        # conv1: Conv1d(12, 64, 15, stride=2, pad=7)
    L_out = (L + 2 * 7 - K) // 2 + 1         # = 8
    hidden_dim = C_out * L_out               # 512  (args.hidden_dim)
    embedding_dim = 64                       # args.embedding_dim == args.input_dim == 64
    num_classes = 8                          # args.num_classes

    keys = iter(jax.random.split(jax.random.PRNGKey(0), 16))
    x1 = jax.random.normal(next(keys), (B, C_in, L), jnp.float32)
    x2 = jax.random.normal(next(keys), (B, C_in, L), jnp.float32)

    conv_w = 0.05 * jax.random.normal(next(keys), (C_out, C_in, K), jnp.float32)
    w1 = 0.04 * jax.random.normal(next(keys), (embedding_dim, hidden_dim), jnp.float32)
    b1 = 0.01 * jax.random.normal(next(keys), (embedding_dim,), jnp.float32)
    w2 = 0.10 * jax.random.normal(next(keys), (num_classes, embedding_dim), jnp.float32)
    b2 = 0.01 * jax.random.normal(next(keys), (num_classes,), jnp.float32)
    bn_gamma = 1.0 + 0.1 * jax.random.normal(next(keys), (C_out,), jnp.float32)
    bn_beta = 0.1 * jax.random.normal(next(keys), (C_out,), jnp.float32)
    bn_mean = 0.05 * jax.random.normal(next(keys), (C_out,), jnp.float32)
    bn_var = 1.0 + 0.1 * jax.random.uniform(next(keys), (C_out,), jnp.float32)

    params, cfg = prepare_params(conv_w, w1, b1, w2, b2,
                                 bn_gamma, bn_beta, bn_mean, bn_var)
    forward = build_forward(cfg)

    out = forward(x1, x2, params["wc"], params["bc"], params["w1r"],
                  params["b1f"], params["w2t"], params["b2r"])
    out = jax.block_until_ready(out)
    assert out.shape == (2 * B, num_classes)

    ref = ref_forward(x1, x2, conv_w, w1, b1, w2, b2,
                      bn_gamma, bn_beta, bn_mean, bn_var)
    assert jnp.allclose(out, ref, atol=1e-4, rtol=1e-4), "mismatch vs reference"

    print("KERNEL_OK")
</pallas_src>

<mosaic_0001>
module attributes {stable_mosaic.version = 11 : i64} {
  func.func @kernel(%arg0: i32, %arg1: memref<64x256xf32, #tpu.memory_space<vmem>>, %arg2: memref<256x64xf32, #tpu.memory_space<vmem>>, %arg3: memref<1x64xf32, #tpu.memory_space<vmem>>, %arg4: memref<512x64xf32, #tpu.memory_space<vmem>>, %arg5: memref<1x64xf32, #tpu.memory_space<vmem>>, %arg6: memref<64x8xf32, #tpu.memory_space<vmem>>, %arg7: memref<1x8xf32, #tpu.memory_space<vmem>>, %arg8: memref<4x8xf32, #tpu.memory_space<vmem>>) attributes {dimension_semantics = [#tpu.dimension_semantics<arbitrary>], iteration_bounds = array<i64: 1>, scalar_prefetch = 0 : i64, scratch_operands = 0 : i64, tpu.core_type = #tpu.core_type<tc>, window_params = [{pipeline_mode = #tpu.pipeline_mode<synchronous>, transform_indices = @transform_0, window_bounds = array<i64: 64, 256>}, {pipeline_mode = #tpu.pipeline_mode<synchronous>, transform_indices = @transform_1, window_bounds = array<i64: 256, 64>}, {pipeline_mode = #tpu.pipeline_mode<synchronous>, transform_indices = @transform_2, window_bounds = array<i64: 1, 64>}, {pipeline_mode = #tpu.pipeline_mode<synchronous>, transform_indices = @transform_3, window_bounds = array<i64: 512, 64>}, {pipeline_mode = #tpu.pipeline_mode<synchronous>, transform_indices = @transform_4, window_bounds = array<i64: 1, 64>}, {pipeline_mode = #tpu.pipeline_mode<synchronous>, transform_indices = @transform_5, window_bounds = array<i64: 64, 8>}, {pipeline_mode = #tpu.pipeline_mode<synchronous>, transform_indices = @transform_6, window_bounds = array<i64: 1, 8>}, {pipeline_mode = #tpu.pipeline_mode<synchronous>, transform_indices = @transform_7, window_bounds = array<i64: 4, 8>}]} {
    %c0 = arith.constant 0 : index
    %c0_0 = arith.constant 0 : index
    %0 = vector.load %arg1[%c0, %c0_0] : memref<64x256xf32, #tpu.memory_space<vmem>>, vector<64x256xf32>
    %c0_1 = arith.constant 0 : index
    %c0_2 = arith.constant 0 : index
    %1 = vector.load %arg2[%c0_1, %c0_2] : memref<256x64xf32, #tpu.memory_space<vmem>>, vector<256x64xf32>
    %cst = arith.constant dense<0.000000e+00> : vector<64x64xf32>
    %2 = tpu.matmul %0, %1, %cst {dimension_numbers = #tpu.dot_dimension_numbers<[1], [0], [0], [1], [0, 0, 1, 1], [], []>} : vector<64x256xf32>, vector<256x64xf32>, vector<64x64xf32> -> vector<64x64xf32>
    %c0_3 = arith.constant 0 : index
    %c0_4 = arith.constant 0 : index
    %3 = vector.load %arg3[%c0_3, %c0_4] : memref<1x64xf32, #tpu.memory_space<vmem>>, vector<1x64xf32>
    %4 = vector.broadcast %3 : vector<1x64xf32> to vector<64x64xf32>
    %5 = arith.addf %2, %4 : vector<64x64xf32>
    %cst_5 = arith.constant 0.000000e+00 : f32
    %6 = vector.broadcast %cst_5 : f32 to vector<64x64xf32>
    %7 = arith.maximumf %5, %6 : vector<64x64xf32>
    %cst_6 = arith.constant 0.000000e+00 : f32
    %8 = vector.broadcast %cst_6 : f32 to vector<8x64xf32>
    %9 = vector.extract_strided_slice %7 {offsets = [0, 0], sizes = [8, 64], strides = [1, 1]} : vector<64x64xf32> to vector<8x64xf32>
    %c0_7 = arith.constant 0 : index
    %c0_8 = arith.constant 0 : index
    %10 = vector.load %arg4[%c0_7, %c0_8] : memref<512x64xf32, #tpu.memory_space<vmem>>, vector<64x64xf32>
    %cst_9 = arith.constant dense<0.000000e+00> : vector<8x64xf32>
    %11 = tpu.matmul %9, %10, %cst_9 {dimension_numbers = #tpu.dot_dimension_numbers<[1], [0], [0], [1], [0, 0, 1, 1], [], []>} : vector<8x64xf32>, vector<64x64xf32>, vector<8x64xf32> -> vector<8x64xf32>
    %12 = arith.addf %8, %11 : vector<8x64xf32>
    %13 = vector.extract_strided_slice %7 {offsets = [8, 0], sizes = [8, 64], strides = [1, 1]} : vector<64x64xf32> to vector<8x64xf32>
    %c64 = arith.constant 64 : index
    %c0_10 = arith.constant 0 : index
    %14 = vector.load %arg4[%c64, %c0_10] : memref<512x64xf32, #tpu.memory_space<vmem>>, vector<64x64xf32>
    %cst_11 = arith.constant dense<0.000000e+00> : vector<8x64xf32>
    %15 = tpu.matmul %13, %14, %cst_11 {dimension_numbers = #tpu.dot_dimension_numbers<[1], [0], [0], [1], [0, 0, 1, 1], [], []>} : vector<8x64xf32>, vector<64x64xf32>, vector<8x64xf32> -> vector<8x64xf32>
    %16 = arith.addf %12, %15 : vector<8x64xf32>
    %17 = vector.extract_strided_slice %7 {offsets = [16, 0], sizes = [8, 64], strides = [1, 1]} : vector<64x64xf32> to vector<8x64xf32>
    %c128 = arith.constant 128 : index
    %c0_12 = arith.constant 0 : index
    %18 = vector.load %arg4[%c128, %c0_12] : memref<512x64xf32, #tpu.memory_space<vmem>>, vector<64x64xf32>
    %cst_13 = arith.constant dense<0.000000e+00> : vector<8x64xf32>
    %19 = tpu.matmul %17, %18, %cst_13 {dimension_numbers = #tpu.dot_dimension_numbers<[1], [0], [0], [1], [0, 0, 1, 1], [], []>} : vector<8x64xf32>, vector<64x64xf32>, vector<8x64xf32> -> vector<8x64xf32>
    %20 = arith.addf %16, %19 : vector<8x64xf32>
    %21 = vector.extract_strided_slice %7 {offsets = [24, 0], sizes = [8, 64], strides = [1, 1]} : vector<64x64xf32> to vector<8x64xf32>
    %c192 = arith.constant 192 : index
    %c0_14 = arith.constant 0 : index
    %22 = vector.load %arg4[%c192, %c0_14] : memref<512x64xf32, #tpu.memory_space<vmem>>, vector<64x64xf32>
    %cst_15 = arith.constant dense<0.000000e+00> : vector<8x64xf32>
    %23 = tpu.matmul %21, %22, %cst_15 {dimension_numbers = #tpu.dot_dimension_numbers<[1], [0], [0], [1], [0, 0, 1, 1], [], []>} : vector<8x64xf32>, vector<64x64xf32>, vector<8x64xf32> -> vector<8x64xf32>
    %24 = arith.addf %20, %23 : vector<8x64xf32>
    %25 = vector.extract_strided_slice %7 {offsets = [32, 0], sizes = [8, 64], strides = [1, 1]} : vector<64x64xf32> to vector<8x64xf32>
    %c256 = arith.constant 256 : index
    %c0_16 = arith.constant 0 : index
    %26 = vector.load %arg4[%c256, %c0_16] : memref<512x64xf32, #tpu.memory_space<vmem>>, vector<64x64xf32>
    %cst_17 = arith.constant dense<0.000000e+00> : vector<8x64xf32>
    %27 = tpu.matmul %25, %26, %cst_17 {dimension_numbers = #tpu.dot_dimension_numbers<[1], [0], [0], [1], [0, 0, 1, 1], [], []>} : vector<8x64xf32>, vector<64x64xf32>, vector<8x64xf32> -> vector<8x64xf32>
    %28 = arith.addf %24, %27 : vector<8x64xf32>
    %29 = vector.extract_strided_slice %7 {offsets = [40, 0], sizes = [8, 64], strides = [1, 1]} : vector<64x64xf32> to vector<8x64xf32>
    %c320 = arith.constant 320 : index
    %c0_18 = arith.constant 0 : index
    %30 = vector.load %arg4[%c320, %c0_18] : memref<512x64xf32, #tpu.memory_space<vmem>>, vector<64x64xf32>
    %cst_19 = arith.constant dense<0.000000e+00> : vector<8x64xf32>
    %31 = tpu.matmul %29, %30, %cst_19 {dimension_numbers = #tpu.dot_dimension_numbers<[1], [0], [0], [1], [0, 0, 1, 1], [], []>} : vector<8x64xf32>, vector<64x64xf32>, vector<8x64xf32> -> vector<8x64xf32>
    %32 = arith.addf %28, %31 : vector<8x64xf32>
    %33 = vector.extract_strided_slice %7 {offsets = [48, 0], sizes = [8, 64], strides = [1, 1]} : vector<64x64xf32> to vector<8x64xf32>
    %c384 = arith.constant 384 : index
    %c0_20 = arith.constant 0 : index
    %34 = vector.load %arg4[%c384, %c0_20] : memref<512x64xf32, #tpu.memory_space<vmem>>, vector<64x64xf32>
    %cst_21 = arith.constant dense<0.000000e+00> : vector<8x64xf32>
    %35 = tpu.matmul %33, %34, %cst_21 {dimension_numbers = #tpu.dot_dimension_numbers<[1], [0], [0], [1], [0, 0, 1, 1], [], []>} : vector<8x64xf32>, vector<64x64xf32>, vector<8x64xf32> -> vector<8x64xf32>
    %36 = arith.addf %32, %35 : vector<8x64xf32>
    %37 = vector.extract_strided_slice %7 {offsets = [56, 0], sizes = [8, 64], strides = [1, 1]} : vector<64x64xf32> to vector<8x64xf32>
    %c448 = arith.constant 448 : index
    %c0_22 = arith.constant 0 : index
    %38 = vector.load %arg4[%c448, %c0_22] : memref<512x64xf32, #tpu.memory_space<vmem>>, vector<64x64xf32>
    %cst_23 = arith.constant dense<0.000000e+00> : vector<8x64xf32>
    %39 = tpu.matmul %37, %38, %cst_23 {dimension_numbers = #tpu.dot_dimension_numbers<[1], [0], [0], [1], [0, 0, 1, 1], [], []>} : vector<8x64xf32>, vector<64x64xf32>, vector<8x64xf32> -> vector<8x64xf32>
    %40 = arith.addf %36, %39 : vector<8x64xf32>
    %c0_24 = arith.constant 0 : index
    %c0_25 = arith.constant 0 : index
    %41 = vector.load %arg5[%c0_24, %c0_25] : memref<1x64xf32, #tpu.memory_space<vmem>>, vector<1x64xf32>
    %42 = vector.broadcast %41 : vector<1x64xf32> to vector<8x64xf32>
    %43 = arith.addf %40, %42 : vector<8x64xf32>
    %cst_26 = arith.constant 0.000000e+00 : f32
    %44 = vector.broadcast %cst_26 : f32 to vector<8x64xf32>
    %45 = arith.maximumf %43, %44 : vector<8x64xf32>
    %c0_27 = arith.constant 0 : index
    %c0_28 = arith.constant 0 : index
    %46 = vector.load %arg6[%c0_27, %c0_28] : memref<64x8xf32, #tpu.memory_space<vmem>>, vector<64x8xf32>
    %cst_29 = arith.constant dense<0.000000e+00> : vector<8x8xf32>
    %47 = tpu.matmul %45, %46, %cst_29 {dimension_numbers = #tpu.dot_dimension_numbers<[1], [0], [0], [1], [0, 0, 1, 1], [], []>} : vector<8x64xf32>, vector<64x8xf32>, vector<8x8xf32> -> vector<8x8xf32>
    %c0_30 = arith.constant 0 : index
    %c0_31 = arith.constant 0 : index
    %48 = vector.load %arg7[%c0_30, %c0_31] : memref<1x8xf32, #tpu.memory_space<vmem>>, vector<1x8xf32>
    %49 = vector.broadcast %48 : vector<1x8xf32> to vector<8x8xf32>
    %50 = arith.addf %47, %49 : vector<8x8xf32>
    %51 = vector.extract_strided_slice %50 {offsets = [0, 0], sizes = [4, 8], strides = [1, 1]} : vector<8x8xf32> to vector<4x8xf32>
    %c0_32 = arith.constant 0 : index
    %c0_33 = arith.constant 0 : index
    %52 = vector.load %arg8[%c0_32, %c0_33] : memref<4x8xf32, #tpu.memory_space<vmem>>, vector<4x8xf32>
    tpu.vector_store %arg8[%c0_32, %c0_33], %51 {strides = array<i32>} : memref<4x8xf32, #tpu.memory_space<vmem>>, vector<4x8xf32>,
    return
  }
  func.func @transform_0(%arg0: i32) -> (i32, i32) {
    %c0_i32 = arith.constant 0 : i32
    %c0_i32_0 = arith.constant 0 : i32
    %c0_i32_1 = arith.constant 0 : i32
    return %c0_i32, %c0_i32_0 : i32, i32
  }
  func.func @transform_1(%arg0: i32) -> (i32, i32) {
    %c0_i32 = arith.constant 0 : i32
    %c0_i32_0 = arith.constant 0 : i32
    %c0_i32_1 = arith.constant 0 : i32
    return %c0_i32, %c0_i32_0 : i32, i32
  }
  func.func @transform_2(%arg0: i32) -> (i32, i32) {
    %c0_i32 = arith.constant 0 : i32
    %c0_i32_0 = arith.constant 0 : i32
    %c0_i32_1 = arith.constant 0 : i32
    return %c0_i32, %c0_i32_0 : i32, i32
  }
  func.func @transform_3(%arg0: i32) -> (i32, i32) {
    %c0_i32 = arith.constant 0 : i32
    %c0_i32_0 = arith.constant 0 : i32
    %c0_i32_1 = arith.constant 0 : i32
    return %c0_i32, %c0_i32_0 : i32, i32
  }
  func.func @transform_4(%arg0: i32) -> (i32, i32) {
    %c0_i32 = arith.constant 0 : i32
    %c0_i32_0 = arith.constant 0 : i32
    %c0_i32_1 = arith.constant 0 : i32
    return %c0_i32, %c0_i32_0 : i32, i32
  }
  func.func @transform_5(%arg0: i32) -> (i32, i32) {
    %c0_i32 = arith.constant 0 : i32
    %c0_i32_0 = arith.constant 0 : i32
    %c0_i32_1 = arith.constant 0 : i32
    return %c0_i32, %c0_i32_0 : i32, i32
  }
  func.func @transform_6(%arg0: i32) -> (i32, i32) {
    %c0_i32 = arith.constant 0 : i32
    %c0_i32_0 = arith.constant 0 : i32
    %c0_i32_1 = arith.constant 0 : i32
    return %c0_i32, %c0_i32_0 : i32, i32
  }
  func.func @transform_7(%arg0: i32) -> (i32, i32) {
    %c0_i32 = arith.constant 0 : i32
    %c0_i32_0 = arith.constant 0 : i32
    %c0_i32_1 = arith.constant 0 : i32
    return %c0_i32, %c0_i32_0 : i32, i32
  }
}

</mosaic_0001>

<bundles_post_ra>
// kernel: forward.1
= control target key start
LH: loop header
LB: loop body
LE: loop exit
PB: predicated region body
PF: predicated region fallthrough
CT: control target
= control target key end

     0   :  { %v1451_v7 = vmov 0.0|0.0   ;;  %s1958_s0 = inlined_call_operand.vmem [shape: f32[64,256], index: 0, kind: input, shape index: {}]   ;;  %s1959_s1 = inlined_call_operand.vmem [shape: f32[256,64], index: 1, kind: input, shape index: {}]   ;;  %s1960_s2 = inlined_call_operand.vmem [shape: f32[1,64], index: 2, kind: input, shape index: {}]   ;;  %s1961_s3 = inlined_call_operand.vmem [shape: f32[512,64], index: 3, kind: input, shape index: {}]   ;;  %s1962_s4 = inlined_call_operand.vmem [shape: f32[1,64], index: 4, kind: input, shape index: {}]   ;;  %s1963_s5 = inlined_call_operand.vmem [shape: f32[64,8], index: 5, kind: input, shape index: {}]   ;;  %s1964_s6 = inlined_call_operand.vmem [shape: f32[1,8], index: 6, kind: input, shape index: {}]   ;;  %s1965_s7 = inlined_call_operand.hbm [shape: f32[4,8], index: 7, kind: output, shape index: {}]  }
   0x1   :  { %v59_v0 = vld [vmem:[%s1959_s1 + $0x80] sm:$0xff]  ;;  %v60_v1 = vld [vmem:[%s1959_s1 + $0x88] sm:$0xff]  ;;  %v61_v5 = vld [vmem:[%s1959_s1 + $0x90] sm:$0xff]  ;;  %1315 = vmatprep.subr.bf16.mxu1 %v1451_v7 }
   0x2   :  { %v43_v2 = vld [vmem:[%s1959_s1] sm:$0xff]  ;;  %v1283_v3 = vpack.c.bf16 %v60_v1, %v59_v0  ;;  %v44_v4 = vld [vmem:[%s1959_s1 + $0x8] sm:$0xff]  ;;  %v62_v6 = vld [vmem:[%s1959_s1 + $0x98] sm:$0xff] }
   0x3   :  { %v1285_v8 = vpack.c.bf16 %v44_v4, %v43_v2  ;;  %v1287_v9 = vpack.c.bf16 %v62_v6, %v61_v5  ;;  %v45_v10 = vld [vmem:[%s1959_s1 + $0x10] sm:$0xff]  ;;  %v46_v11 = vld [vmem:[%s1959_s1 + $0x18] sm:$0xff]  ;;  %v63_v12 = vld [vmem:[%s1959_s1 + $0xa0] sm:$0xff] }
   0x4   :  { %1284 = vmatprep.subr.bf16.mxu0 %v1283_v3  ;;  %v64_v13 = vld [vmem:[%s1959_s1 + $0xa8] sm:$0xff]  ;;  %v1289_v14 = vpack.c.bf16 %v46_v11, %v45_v10  ;;  %v47_v16 = vld [vmem:[%s1959_s1 + $0x20] sm:$0xff]  ;;  %v65_v18 = vld [vmem:[%s1959_s1 + $0xb0] sm:$0xff] }
   0x5   :  { %1286 = vmatpush3.bf16.msra.mxu0 %v1285_v8  ;;  %v1291_v15 = vpack.c.bf16 %v64_v13, %v63_v12  ;;  %v48_v17 = vld [vmem:[%s1959_s1 + $0x28] sm:$0xff]  ;;  %v66_v19 = vld [vmem:[%s1959_s1 + $0xb8] sm:$0xff]  ;;  %v49_v22 = vld [vmem:[%s1959_s1 + $0x30] sm:$0xff] }
   0x6   :  { %1288 = vmatprep.subr.bf16.mxu0 %v1287_v9  ;;  %v1293_v20 = vpack.c.bf16 %v48_v17, %v47_v16  ;;  %v1295_v21 = vpack.c.bf16 %v66_v19, %v65_v18  ;;  %v50_v23 = vld [vmem:[%s1959_s1 + $0x38] sm:$0xff]  ;;  %v67_v24 = vld [vmem:[%s1959_s1 + $0xc0] sm:$0xff]  ;;  %v68_v25 = vld [vmem:[%s1959_s1 + $0xc8] sm:$0xff] }
   0x7   :  { %v28_v26 = vld [vmem:[%s1958_s0 + $0x8] sm:$0xff]  ;;  %v1297_v27 = vpack.c.bf16 %v50_v23, %v49_v22  ;;  %v1299_v28 = vpack.c.bf16 %v68_v25, %v67_v24  ;;  %v51_v29 = vld [vmem:[%s1959_s1 + $0x40] sm:$0xff]  ;;  %v69_v31 = vld [vmem:[%s1959_s1 + $0xd0] sm:$0xff] }
   0x8   :  { %146 = vmatprep.mubr.f32.mxu0 %v28_v26  ;;  %v52_v30 = vld [vmem:[%s1959_s1 + $0x48] sm:$0xff]  ;;  %v70_v32 = vld [vmem:[%s1959_s1 + $0xd8] sm:$0xff]  ;;  %v203_v34 = vld [vmem:[%s1961_s3 + $0x40] sm:$0xff] }
   0x9   :  { %1290 = vmatpush3.bf16.msra.mxu0 %v1289_v14  ;;  %v1301_v33 = vpack.c.bf16 %v52_v30, %v51_v29  ;;  %v204_v35 = vld [vmem:[%s1961_s3 + $0x48] sm:$0xff] }
   0xa   :  { %1292 = vmatprep.subr.bf16.mxu0 %v1291_v15 }
   0xd   :  { %1294 = vmatpush3.bf16.msra.mxu0 %v1293_v20 }
   0xe   :  { %1296 = vmatprep.subr.bf16.mxu0 %v1295_v21 }
  0x11   :  { %1298 = vmatpush3.bf16.msra.mxu0 %v1297_v27 }
  0x12   :  { %12 = vsyncpa [#allocation3], 0  ;;  %1300 = vmatprep.subr.bf16.mxu0 %v1299_v28  ;;  %v1303_v36 = vpack.c.bf16 %v70_v32, %v69_v31  ;;  %v53_v37 = vld [vmem:[%s1959_s1 + $0x50] sm:$0xff]  ;;  %v54_v38 = vld [vmem:[%s1959_s1 + $0x58] sm:$0xff]  ;;  %v1316_v39 = vpack.c.bf16 %v204_v35, %v203_v34  ;;  %vm1452_vm0 = vmmov 0   ;;  %v1453_v14 = vmov 0.0  }
  0x13   :  { %v71_v40 = vld [vmem:[%s1959_s1 + $0xe0] sm:$0xff]  ;;  %v72_v41 = vld [vmem:[%s1959_s1 + $0xe8] sm:$0xff]  ;;  %v1305_v42 = vpack.c.bf16 %v54_v38, %v53_v37  ;;  %v73_v46 = vld [vmem:[%s1959_s1 + $0xf0] sm:$0xff]  ;;  %1128 = vmatprep.mubr.msk.f32.mxu1 %vm1452_vm0, %v1453_v14  ;;  %vm211_vm1 = vcmask 523264   ;;  %s1454_s20 = smov [#allocation2]   ;;  %vm947_vm2 = vcmask 60416  }
  0x14   :  { %1317 = vmatpush3.bf16.msra.mxu1 %v1316_v39  ;;  %v1307_v43 = vpack.c.bf16 %v72_v41, %v71_v40  ;;  %v55_v44 = vld [vmem:[%s1959_s1 + $0x60] sm:$0xff]  ;;  %v56_v45 = vld [vmem:[%s1959_s1 + $0x68] sm:$0xff]  ;;  %v74_v47 = vld [vmem:[%s1959_s1 + $0xf8] sm:$0xff]  ;;  %s955_s21 = sshll.u32 %s1454_s20, 4  ;;  %s956_s21 = int_to_ptr.vmem [resolvable:$true] %s955_s21 }
  0x15   :  { %1302 = vmatpush3.bf16.msra.mxu0 %v1301_v33  ;;  %1318 = vmatprep.subr.bf16.mxu1 %v1451_v7  ;;  %v1309_v48 = vpack.c.bf16 %v56_v45, %v55_v44  ;;  %v1311_v49 = vpack.c.bf16 %v74_v47, %v73_v46  ;;  %v57_v50 = vld [vmem:[%s1959_s1 + $0x70] sm:$0xff]  ;;  %v58_v51 = vld [vmem:[%s1959_s1 + $0x78] sm:$0xff]  ;;  %v27_v53 = vld [vmem:[%s1958_s0] sm:$0xff]  ;;  %s1427_s22 = scalar_lea.vmem %s956_s21, 64  ;;  %p1432_p1 = scmp.lt.s32.totalorder %s956_s21, %s956_s21 }
  0x16   :  { %1304 = vmatprep.subr.bf16.mxu0 %v1303_v36  ;;  %v1313_v52 = vpack.c.bf16 %v58_v51, %v57_v50  ;;  %v30_v54 = vld [vmem:[%s1958_s0 + $0x18] sm:$0xff]  ;;  %v29_v55 = vld [vmem:[%s1958_s0 + $0x10] sm:$0xff]  ;;  %v32_v56 = vld [vmem:[%s1958_s0 + $0x28] sm:$0xff]  ;;  %p1428_p0 = scmp.ne.s32.totalorder %s956_s21, %s1427_s22  ;;  %p1433_p2 = scmp.lt.s32.totalorder %s1427_s22, %s1427_s22 }
  0x17   :  { %v31_v57 = vld [vmem:[%s1958_s0 + $0x20] sm:$0xff]  ;;  %v34_v58 = vld [vmem:[%s1958_s0 + $0x38] sm:$0xff]  ;;  %v33_v59 = vld [vmem:[%s1958_s0 + $0x30] sm:$0xff] }
  0x18   :  { %v36_v60 = vld [vmem:[%s1958_s0 + $0x48] sm:$0xff]  ;;  %v35_v61 = vld [vmem:[%s1958_s0 + $0x40] sm:$0xff]  ;;  %v38_v62 = vld [vmem:[%s1958_s0 + $0x58] sm:$0xff]  ;;  %p1434_p3 = por %p1433_p2, %p1432_p1 }
  0x19   :  { %1306 = vmatpush3.bf16.msra.mxu0 %v1305_v42  ;;  %v37_v63 = vld [vmem:[%s1958_s0 + $0x50] sm:$0xff]  ;;  %v40_v0 = vld [vmem:[%s1958_s0 + $0x68] sm:$0xff]  ;;  %v39_v1 = vld [vmem:[%s1958_s0 + $0x60] sm:$0xff] }
  0x1a   :  { %1308 = vmatprep.subr.bf16.mxu0 %v1307_v43  ;;  %v42_v2 = vld [vmem:[%s1958_s0 + $0x78] sm:$0xff]  ;;  %v41_v3 = vld [vmem:[%s1958_s0 + $0x70] sm:$0xff]  ;;  %v207_v8 = vld [vmem:[%s1961_s3 + $0x60] sm:$0xff]  ;;  %p1435_p4 = pnand %p1434_p3, %p1428_p0 }
  0x1b   :  { %v205_v4 = vld [vmem:[%s1961_s3 + $0x50] sm:$0xff]  ;;  %v206_v5 = vld [vmem:[%s1961_s3 + $0x58] sm:$0xff]  ;;  %v208_v9 = vld [vmem:[%s1961_s3 + $0x68] sm:$0xff] }
  0x1c   :  { %v1319_v6 = vpack.c.bf16 %v206_v5, %v205_v4  ;;  %v1322_v10 = vpack.c.bf16 %v208_v9, %v207_v8  ;;  %v209_v11 = vld [vmem:[%s1961_s3 + $0x70] sm:$0xff]  ;;  %v210_v12 = vld [vmem:[%s1961_s3 + $0x78] sm:$0xff]  ;;  %v440_v15 = vld [vmem:[%s1961_s3 + $0xc0] sm:$0xff] }
  0x1d   :  { %1310 = vmatpush3.bf16.msra.mxu0 %v1309_v48  ;;  %v1325_v13 = vpack.c.bf16 %v210_v12, %v209_v11  ;;  %v441_v16 = vld [vmem:[%s1961_s3 + $0xc8] sm:$0xff]  ;;  %v442_v18 = vld [vmem:[%s1961_s3 + $0xd0] sm:$0xff]  ;;  %v443_v19 = vld [vmem:[%s1961_s3 + $0xd8] sm:$0xff] }
  0x1e   :  { %1312 = vmatprep.subr.bf16.mxu0 %v1311_v49  ;;  %1320 = vmatpush3.bf16.msra.mxu1 %v1319_v6  ;;  %v1352_v17 = vpack.c.bf16 %v441_v16, %v440_v15  ;;  %v1355_v20 = vpack.c.bf16 %v443_v19, %v442_v18  ;;  %v444_v21 = vld [vmem:[%s1961_s3 + $0xe0] sm:$0xff]  ;;  %v445_v22 = vld [vmem:[%s1961_s3 + $0xe8] sm:$0xff]  ;;  %v446_v24 = vld [vmem:[%s1961_s3 + $0xf0] sm:$0xff] }
  0x1f   :  { %1321 = vmatprep.subr.bf16.mxu1 %v1451_v7  ;;  %v1358_v23 = vpack.c.bf16 %v445_v22, %v444_v21  ;;  %v447_v25 = vld [vmem:[%s1961_s3 + $0xf8] sm:$0xff]  ;;  %v195_v33 = vld [vmem:[%s1961_s3] sm:$0xff]  ;;  %v196_v34 = vld [vmem:[%s1961_s3 + $0x8] sm:$0xff] }
  0x20   :  { %v1361_v26 = vpack.c.bf16 %v447_v25, %v446_v24  ;;  %v1710_v35 = vld [vmem:[%s1960_s2] ss:$0 sm:$0xff]  ;;  %v1328_v38 = vpack.c.bf16 %v196_v34, %v195_v33  ;;  %v197_v41 = vld [vmem:[%s1961_s3 + $0x10] sm:$0xff]  ;;  %v198_v42 = vld [vmem:[%s1961_s3 + $0x18] sm:$0xff] }
  0x21   :  { %1314 = vmatpush3.bf16.msra.mxu0 %v1313_v52  ;;  %v1331_v45 = vpack.c.bf16 %v198_v42, %v197_v41  ;;  %v199_v46 = vld [vmem:[%s1961_s3 + $0x20] sm:$0xff]  ;;  %v200_v48 = vld [vmem:[%s1961_s3 + $0x28] sm:$0xff]  ;;  %v360_v15 = vld [vmem:[%s1961_s3 + $0x90] sm:$0xff] }
  0x22   :  { %1351 = vmatprep.subr.bf16.mxu0 %v1451_v7  ;;  %1323 = vmatpush3.bf16.msra.mxu1 %v1322_v10  ;;  %v604_v50 = vld [vmem:[%s1961_s3 + $0x140] sm:$0xff]  ;;  %v605_v51 = vld [vmem:[%s1961_s3 + $0x148] sm:$0xff]  ;;  %v361_v16 = vld [vmem:[%s1961_s3 + $0x98] sm:$0xff] }
  0x23   :  { %1324 = vmatprep.subr.bf16.mxu1 %v1451_v7  ;;  %v358_v4 = vld [vmem:[%s1961_s3 + $0x80] sm:$0xff]  ;;  %v359_v5 = vld [vmem:[%s1961_s3 + $0x88] sm:$0xff]  ;;  %v610_v19 = vld [vmem:[%s1961_s3 + $0x170] sm:$0xff] }
  0x24   :  { %147 = vmatmul.mubr.f32.vlgmr.msra.gmra.mrb[0].mxu0 %v27_v53  ;;  %v608_v8 = vld [vmem:[%s1961_s3 + $0x160] sm:$0xff]  ;;  %v609_v9 = vld [vmem:[%s1961_s3 + $0x168] sm:$0xff]  ;;  %v1340_v11 = vpack.c.bf16 %v359_v5, %v358_v4  ;;  %v364_v34 = vld [vmem:[%s1961_s3 + $0xb0] sm:$0xff] }
  0x25   :  { %151 = vmatprep.mubr.f32.mxu0 %v30_v54  ;;  %1353 = vmatpush3.bf16.msra.mxu0 %v1352_v17  ;;  %v1334_v54 = vpack.c.bf16 %v200_v48, %v199_v46  ;;  %v1382_v17 = vpack.c.bf16 %v609_v9, %v608_v8  ;;  %v522_v42 = vld [vmem:[%s1961_s3 + $0x100] sm:$0xff]  ;;  %v691_v9 = vld [vmem:[%s1961_s3 + $0x1a8] sm:$0xff] }
  0x26   :  { %1326 = vmatpush3.bf16.msra.mxu1 %v1325_v13  ;;  %1354 = vmatprep.subr.bf16.mxu0 %v1451_v7  ;;  %v772_v46 = vld [vmem:[%s1961_s3 + $0x1e0] sm:$0xff] }
  0x27   :  { %1327 = vmatprep.subr.bf16.mxu1 %v1451_v7  ;;  %v690_v8 = vld [vmem:[%s1961_s3 + $0x1a0] sm:$0xff] }
  0x28   :  { %152 = vmatmul.mubr.f32.gmra.mrb[2].mxu0 %v29_v55  ;;  %v201_v55 = vld [vmem:[%s1961_s3 + $0x30] sm:$0xff] }
  0x29   :  { %156 = vmatprep.mubr.f32.mxu0 %v32_v56  ;;  %1356 = vmatpush3.bf16.msra.mxu0 %v1355_v20  ;;  %v1376_v56 = vpack.c.bf16 %v605_v51, %v604_v50  ;;  %v611_v20 = vld [vmem:[%s1961_s3 + $0x178] sm:$0xff] }
  0x2a   :  { %1357 = vmatprep.subr.bf16.mxu0 %v1451_v7  ;;  %v525_v50 = vld [vmem:[%s1961_s3 + $0x118] sm:$0xff] }
  0x2c   :  { %157 = vmatmul.mubr.f32.gmra.mrb[4].mxu0 %v31_v57 }
  0x2d   :  { %161 = vmatprep.mubr.f32.mxu0 %v34_v58  ;;  %1359 = vmatpush3.bf16.msra.mxu0 %v1358_v23  ;;  %v202_v58 = vld [vmem:[%s1961_s3 + $0x38] sm:$0xff]  ;;  %v1343_v23 = vpack.c.bf16 %v361_v16, %v360_v15  ;;  %v859_v16 = vld [vmem:[%s1963_s5] sm:$0xff] }
  0x2e   :  { %1360 = vmatprep.subr.bf16.mxu0 %v1451_v7 }
  0x30   :  { %162 = vmatmul.mubr.f32.gmra.mrb[6].mxu0 %v33_v59 }
  0x31   :  { %166 = vmatprep.mubr.f32.mxu0 %v36_v60  ;;  %1362 = vmatpush3.bf16.msra.mxu0 %v1361_v26  ;;  %v606_v60 = vld [vmem:[%s1961_s3 + $0x150] sm:$0xff]  ;;  %v362_v26 = vld [vmem:[%s1961_s3 + $0xa0] sm:$0xff] }
  0x32   :  { %1375 = vmatprep.subr.bf16.mxu0 %v1451_v7 }
  0x34   :  { %167 = vmatmul.mubr.f32.gmra.mrb[8].mxu0 %v35_v61  ;;  %v607_v61 = vld [vmem:[%s1961_s3 + $0x158] sm:$0xff] }
  0x35   :  { %171 = vmatprep.mubr.f32.mxu0 %v38_v62 }
  0x38   :  { %172 = vmatmul.mubr.f32.gmra.mrb[10].mxu0 %v37_v63 }
  0x39   :  { %176 = vmatprep.mubr.f32.mxu0 %v40_v0  ;;  %v1337_v0 = vpack.c.bf16 %v202_v58, %v201_v55 }
  0x3c   :  { %177 = vmatmul.mubr.f32.gmra.mrb[12].mxu0 %v39_v1  ;;  %v1379_v1 = vpack.c.bf16 %v607_v61, %v606_v60  ;;  %v528_v61 = vld [vmem:[%s1961_s3 + $0x130] sm:$0xff] }
  0x3d   :  { %181 = vmatprep.mubr.f32.mxu0 %v42_v2 }
  0x40   :  { %182 = vmatmul.mubr.f32.gmra.mrb[14].mxu0 %v41_v3 }
  0x41   :  { %1185 = vmatprep.mubr.msk.f32.mxu0 %vm1452_vm0, %v1453_v14 }
  0xf7   :  { %v1007_v27 = vpop.f32.mrb[0].mxu0 }
  0xf8   :  { %v1008_v28 = vpop.f32.mrb[1].mxu0 }
  0xf9   :  { %v1009_v29 = vadd.f32 %v1008_v28, %v1007_v27  ;;  %v363_v27 = vld [vmem:[%s1961_s3 + $0xa8] sm:$0xff]  ;;  %v1385_v28 = vpack.c.bf16 %v611_v20, %v610_v19  ;;  %v862_v20 = vld [vmem:[%s1963_s5 + $0x18] sm:$0xff] }
  0xfb   :  { %v1010_v30 = vpop.f32.mrb[2].mxu0  ;;  %v149_v3 = vadd.f32 %v1009_v29, %v1710_v35 }
  0xfc   :  { %v1011_v31 = vpop.f32.mrb[3].mxu0 }
  0xfd   :  { %v1012_v32 = vadd.f32 %v1011_v31, %v1010_v30  ;;  %v187_v13 = vmax.f32 %v149_v3, 0.0  ;;  %v768_v30 = vld [vmem:[%s1961_s3 + $0x1c0] sm:$0xff]  ;;  %v769_v31 = vld [vmem:[%s1961_s3 + $0x1c8] sm:$0xff] }
  0xfe   :  { %v687_v3 = vld [vmem:[%s1961_s3 + $0x188] sm:$0xff] }
  0xff   :  { %v154_v36 = vadd.f32 %v1012_v32, %v1710_v35  ;;  %v1013_v37 = vpop.f32.mrb[4].mxu0  ;;  %v1346_v32 = vpack.c.bf16 %v363_v27, %v362_v26 }
 0x100   :  { %v1014_v39 = vpop.f32.mrb[5].mxu0 }
 0x101   :  { %v188_v40 = vmax.f32 %v154_v36, 0.0  ;;  %v1719_v43 = vadd.f32 %v1014_v39, %v1013_v37  ;;  %v365_v36 = vld [vmem:[%s1961_s3 + $0xb8] sm:$0xff]  ;;  %v1400_v37 = vpack.c.bf16 %v769_v31, %v768_v30 }
 0x102   :  { %v771_v39 = vld [vmem:[%s1961_s3 + $0x1d8] sm:$0xff] }
 0x103   :  { %1129 = vmatmul.mubr.msk.f32.vlgmr.msra.gmra.mrb[0].mxu1 %vm211_vm1, %v188_v40  ;;  %v1016_v44 = vpop.f32.mrb[6].mxu0  ;;  %v1349_v40 = vpack.c.bf16 %v365_v36, %v364_v34  ;;  %v159_v41 = vadd.f32 %v1719_v43, %v1710_v35  ;;  %v773_v43 = vld [vmem:[%s1961_s3 + $0x1e8] sm:$0xff] }
 0x104   :  { %1329 = vmatpush3.bf16.msra.mxu1 %v1328_v38  ;;  %1147 = vmatprep.mubr.msk.f32.mxu1 %vm1452_vm0, %v1453_v14  ;;  %v1017_v47 = vpop.f32.mrb[7].mxu0  ;;  %v770_v38 = vld [vmem:[%s1961_s3 + $0x1d0] sm:$0xff]  ;;  %v1406_v51 = vpack.c.bf16 %v773_v43, %v772_v46 }
 0x105   :  { %1330 = vmatprep.subr.bf16.mxu1 %v1451_v7  ;;  %v1018_v49 = vadd.f32 %v1017_v47, %v1016_v44  ;;  %v523_v44 = vld [vmem:[%s1961_s3 + $0x108] sm:$0xff]  ;;  %v189_v48 = vmax.f32 %v159_v41, 0.0 }
 0x106   :  { %v1364_v47 = vpack.c.bf16 %v523_v44, %v522_v42 }
 0x107   :  { %v164_v52 = vadd.f32 %v1018_v49, %v1710_v35  ;;  %v1019_v53 = vpop.f32.mrb[8].mxu0  ;;  %v524_v49 = vld [vmem:[%s1961_s3 + $0x110] sm:$0xff] }
 0x108   :  { %1332 = vmatpush3.bf16.msra.mxu1 %v1331_v45  ;;  %v1020_v57 = vpop.f32.mrb[9].mxu0  ;;  %v1403_v45 = vpack.c.bf16 %v771_v39, %v770_v38 }
 0x109   :  { %1333 = vmatprep.subr.bf16.mxu1 %v1451_v7  ;;  %v190_v59 = vmax.f32 %v164_v52, 0.0  ;;  %v1751_v62 = vadd.f32 %v1020_v57, %v1019_v53  ;;  %v774_v52 = vld [vmem:[%s1961_s3 + $0x1f0] sm:$0xff]  ;;  %v775_v53 = vld [vmem:[%s1961_s3 + $0x1f8] sm:$0xff]  ;;  %v527_v57 = vld [vmem:[%s1961_s3 + $0x128] sm:$0xff] }
 0x10a   :  { %v1409_v58 = vpack.c.bf16 %v775_v53, %v774_v52  ;;  %v973_v53 = vld [vmem:[%s1964_s6] ss:$0 sm:$0xff] }
 0x10b   :  { %1186 = vmatmul.mubr.msk.f32.vlgmr.msra.gmra.mrb[16].mxu0 %vm211_vm1, %v190_v59  ;;  %v1022_v63 = vpop.f32.mrb[10].mxu0 }
 0x10c   :  { %1335 = vmatpush3.bf16.msra.mxu1 %v1334_v54  ;;  %1377 = vmatpush3.bf16.msra.mxu0 %v1376_v56  ;;  %v1023_v2 = vpop.f32.mrb[11].mxu0  ;;  %v1367_v54 = vpack.c.bf16 %v525_v50, %v524_v49  ;;  %v526_v56 = vld [vmem:[%s1961_s3 + $0x120] sm:$0xff] }
 0x10d   :  { %1336 = vmatprep.subr.bf16.mxu1 %v1451_v7  ;;  %1378 = vmatprep.subr.bf16.mxu0 %v1451_v7  ;;  %v1024_v6 = vadd.f32 %v1023_v2, %v1022_v63  ;;  %v1370_v59 = vpack.c.bf16 %v527_v57, %v526_v56  ;;  %v529_v63 = vld [vmem:[%s1961_s3 + $0x138] sm:$0xff]  ;;  %v686_v2 = vld [vmem:[%s1961_s3 + $0x180] sm:$0xff] }
 0x10e   :  { %1223 = vmatprep.mubr.msk.f32.mxu0 %vm1452_vm0, %v1453_v14  ;;  %v1388_v4 = vpack.c.bf16 %v687_v3, %v686_v2  ;;  %v972_v49 = vld [vmem:[%s1962_s4] ss:$0 sm:$0xff] }
 0x10f   :  { %v1025_v10 = vpop.f32.mrb[12].mxu0  ;;  %v174_v24 = vadd.f32 %v1024_v6, %v1710_v35  ;;  %v688_v6 = vld [vmem:[%s1961_s3 + $0x190] sm:$0xff] }
 0x110   :  { %1338 = vmatpush3.bf16.msra.mxu1 %v1337_v0  ;;  %1380 = vmatpush3.bf16.msra.mxu0 %v1379_v1  ;;  %v1026_v12 = vpop.f32.mrb[13].mxu0  ;;  %v1373_v0 = vpack.c.bf16 %v529_v63, %v528_v61  ;;  %v169_v1 = vadd.f32 %v1751_v62, %v1710_v35 }
 0x111   :  { %1339 = vmatprep.subr.bf16.mxu1 %v1451_v7  ;;  %1381 = vmatprep.subr.bf16.mxu0 %v1451_v7  ;;  %v1027_v18 = vadd.f32 %v1026_v12, %v1025_v10  ;;  %v192_v33 = vmax.f32 %v174_v24, 0.0  ;;  %v1394_v10 = vpack.c.bf16 %v691_v9, %v690_v8  ;;  %v693_v12 = vld [vmem:[%s1961_s3 + $0x1b8] sm:$0xff]  ;;  %v865_v24 = vld [vmem:[%s1963_s5 + $0x30] sm:$0xff] }
 0x112   :  { %v191_v5 = vmax.f32 %v169_v1, 0.0 }
 0x113   :  { %1148 = vmatmul.mubr.msk.f32.vlgmr.msra.gmra.mrb[2].mxu1 %vm211_vm1, %v187_v13  ;;  %v1787_v21 = vadd.f32 %v1027_v18, %v1710_v35  ;;  %v1028_v22 = vpop.f32.mrb[14].mxu0  ;;  %v861_v18 = vld [vmem:[%s1963_s5 + $0x10] sm:$0xff] }
 0x114   :  { %1341 = vmatpush3.bf16.msra.mxu1 %v1340_v11  ;;  %1166 = vmatprep.mubr.msk.f32.mxu1 %vm1452_vm0, %v1453_v14  ;;  %v1029_v25 = vpop.f32.mrb[15].mxu0  ;;  %v692_v11 = vld [vmem:[%s1961_s3 + $0x1b0] sm:$0xff] }
 0x115   :  { %1342 = vmatprep.subr.bf16.mxu1 %v1451_v7  ;;  %1383 = vmatpush3.bf16.msra.mxu0 %v1382_v17  ;;  %v1030_v29 = vadd.f32 %v1029_v25, %v1028_v22  ;;  %v1397_v13 = vpack.c.bf16 %v693_v12, %v692_v11  ;;  %v193_v15 = vmax.f32 %v1787_v21, 0.0  ;;  %v860_v17 = vld [vmem:[%s1963_s5 + $0x8] sm:$0xff]  ;;  %v1415_v21 = vpack.c.bf16 %v862_v20, %v861_v18  ;;  %v866_v25 = vld [vmem:[%s1963_s5 + $0x38] sm:$0xff] }
 0x116   :  { %1384 = vmatprep.subr.bf16.mxu0 %v1451_v7  ;;  %v1412_v19 = vpack.c.bf16 %v860_v17, %v859_v16  ;;  %v864_v22 = vld [vmem:[%s1963_s5 + $0x28] sm:$0xff]  ;;  %v1421_v26 = vpack.c.bf16 %v866_v25, %v865_v24 }
 0x117   :  { %v184_v55 = vadd.f32 %v1030_v29, %v1710_v35  ;;  %v689_v35 = vld [vmem:[%s1961_s3 + $0x198] sm:$0xff] }
 0x118   :  { %1344 = vmatpush3.bf16.msra.mxu1 %v1343_v23  ;;  %v1391_v62 = vpack.c.bf16 %v689_v35, %v688_v6 }
 0x119   :  { %1345 = vmatprep.subr.bf16.mxu1 %v1451_v7  ;;  %1386 = vmatpush3.bf16.msra.mxu0 %v1385_v28  ;;  %v194_v60 = vmax.f32 %v184_v55, 0.0 }
 0x11a   :  { %1399 = vmatprep.subr.bf16.mxu0 %v1451_v7 }
 0x11c   :  { %1347 = vmatpush3.bf16.msra.mxu1 %v1346_v32  ;;  %1224 = vmatmul.mubr.msk.f32.vlgmr.msra.gmra.mrb[18].mxu0 %vm211_vm1, %v192_v33 }
 0x11d   :  { %1348 = vmatprep.subr.bf16.mxu1 %v1451_v7  ;;  %1401 = vmatpush3.bf16.msra.mxu0 %v1400_v37 }
 0x11e   :  { %1402 = vmatprep.subr.bf16.mxu0 %v1451_v7  ;;  %1261 = vmatprep.mubr.msk.f32.mxu0 %vm1452_vm0, %v1453_v14 }
 0x120   :  { %1350 = vmatpush3.bf16.msra.mxu1 %v1349_v40 }
 0x121   :  { %1363 = vmatprep.subr.bf16.mxu1 %v1451_v7  ;;  %1404 = vmatpush3.bf16.msra.mxu0 %v1403_v45 }
 0x122   :  { %1405 = vmatprep.subr.bf16.mxu0 %v1451_v7 }
 0x123   :  { %1167 = vmatmul.mubr.msk.f32.vlgmr.msra.gmra.mrb[4].mxu1 %vm211_vm1, %v189_v48 }
 0x124   :  { %1365 = vmatpush3.bf16.msra.mxu1 %v1364_v47  ;;  %1204 = vmatprep.mubr.msk.f32.mxu1 %vm1452_vm0, %v1453_v14 }
 0x125   :  { %1366 = vmatprep.subr.bf16.mxu1 %v1451_v7  ;;  %1407 = vmatpush3.bf16.msra.mxu0 %v1406_v51 }
 0x126   :  { %1408 = vmatprep.subr.bf16.mxu0 %v1451_v7 }
 0x128   :  { %1368 = vmatpush3.bf16.msra.mxu1 %v1367_v54 }
 0x129   :  { %1369 = vmatprep.subr.bf16.mxu1 %v1451_v7  ;;  %1410 = vmatpush3.bf16.msra.mxu0 %v1409_v58 }
 0x12c   :  { %1371 = vmatpush3.bf16.msra.mxu1 %v1370_v59  ;;  %1262 = vmatmul.mubr.msk.f32.vlgmr.msra.gmra.mrb[20].mxu0 %vm211_vm1, %v194_v60 }
 0x12d   :  { %1372 = vmatprep.subr.bf16.mxu1 %v1451_v7 }
 0x130   :  { %1374 = vmatpush3.bf16.msra.mxu1 %v1373_v0 }
 0x131   :  { %1387 = vmatprep.subr.bf16.mxu1 %v1451_v7 }
 0x133   :  { %1205 = vmatmul.mubr.msk.f32.vlgmr.msra.gmra.mrb[6].mxu1 %vm211_vm1, %v191_v5 }
 0x134   :  { %1389 = vmatpush3.bf16.msra.mxu1 %v1388_v4  ;;  %1242 = vmatprep.mubr.msk.f32.mxu1 %vm1452_vm0, %v1453_v14 }
 0x135   :  { %1390 = vmatprep.subr.bf16.mxu1 %v1451_v7 }
 0x138   :  { %1392 = vmatpush3.bf16.msra.mxu1 %v1391_v62 }
 0x139   :  { %1393 = vmatprep.subr.bf16.mxu1 %v1451_v7 }
 0x13c   :  { %1395 = vmatpush3.bf16.msra.mxu1 %v1394_v10 }
 0x13d   :  { %1396 = vmatprep.subr.bf16.mxu1 %v1451_v7 }
 0x140   :  { %1398 = vmatpush3.bf16.msra.mxu1 %v1397_v13 }
 0x141   :  { %1411 = vmatprep.subr.bf16.mxu1 %v1451_v7 }
 0x143   :  { %1243 = vmatmul.mubr.msk.f32.vlgmr.msra.gmra.mrb[8].mxu1 %vm211_vm1, %v193_v15 }
 0x144   :  { %1280 = vmatprep.mubr.msk.f32.mxu1 %vm1452_vm0, %v1453_v14  ;;  %1413 = vmatpush3.bf16.msra.mxu1 %v1412_v19  ;;  %v863_v14 = vld [vmem:[%s1963_s5 + $0x20] sm:$0xff] }
 0x145   :  { %1414 = vmatprep.subr.bf16.mxu1 %v1451_v7  ;;  %v1418_v23 = vpack.c.bf16 %v864_v22, %v863_v14 }
 0x148   :  { %1416 = vmatpush3.bf16.msra.mxu1 %v1415_v21 }
 0x149   :  { %1417 = vmatprep.subr.bf16.mxu1 %v1451_v7 }
 0x14c   :  { %1419 = vmatpush3.bf16.msra.mxu1 %v1418_v23 }
 0x14d   :  { %1420 = vmatprep.subr.bf16.mxu1 %v1451_v7 }
 0x150   :  { %1422 = vmatpush3.bf16.msra.mxu1 %v1421_v26 }
 0x1d6   :  { %v281_v27 = vpop.f32.mrb[0].mxu1 }
 0x1d7   :  { %v1130_v28 = vpop.f32.mrb[1].mxu1 }
 0x1de   :  { %v517_v29 = vpop.f32.mrb[16].mxu0 }
 0x1df   :  { %v1187_v30 = vpop.f32.mrb[17].mxu0 }
 0x1e6   :  { %v354_v31 = vpop.f32.mrb[2].mxu1 }
 0x1e7   :  { %v355_v32 = vadd.f32 %v354_v31, %v281_v27  ;;  %v1149_v33 = vpop.f32.mrb[3].mxu1 }
 0x1ef   :  { %v681_v34 = vpop.f32.mrb[18].mxu0 }
 0x1f0   :  { %v1225_v36 = vpop.f32.mrb[19].mxu0 }
 0x1f6   :  { %v435_v7 = vpop.f32.mrb[4].mxu1 }
 0x1f7   :  { %v439_v37 = vadd.f32 %v435_v7, %v355_v32  ;;  %v1168_v38 = vpop.f32.mrb[5].mxu1 }
 0x1f9   :  { %v521_v39 = vadd.f32 %v517_v29, %v439_v37 }
 0x1ff   :  { %v845_v40 = vpop.f32.mrb[20].mxu0 }
 0x200   :  { %v1263_v41 = vpop.f32.mrb[21].mxu0 }
 0x206   :  { %v599_v42 = vpop.f32.mrb[6].mxu1 }
 0x207   :  { %v603_v44 = vadd.f32 %v599_v42, %v521_v39  ;;  %v1206_v45 = vpop.f32.mrb[7].mxu1 }
 0x209   :  { %v685_v46 = vadd.f32 %v681_v34, %v603_v44 }
 0x216   :  { %v763_v43 = vpop.f32.mrb[8].mxu1 }
 0x217   :  { %v767_v47 = vadd.f32 %v763_v43, %v685_v46  ;;  %v1244_v48 = vpop.f32.mrb[9].mxu1 }
 0x219   :  { %v849_v50 = vadd.f32 %v845_v40, %v767_v47 }
 0x21b   :  { %v857_v51 = vadd.f32 %v972_v49, %v849_v50 }
 0x21d   :  { %v858_v52 = vmax.f32 %v857_v51, 0.0 }
 0x21f   :  { %1281 = vmatmul.mubr.msk.f32.vlgmr.msra.gmra.mrb[10].mxu1 %vm211_vm1, %v858_v52 }
 0x2f2   :  { %v943_v54 = vpop.f32.mrb[10].mxu1 }
 0x2f3   :  { %v944_v55 = vadd.f32 %v973_v53, %v943_v54  ;;  %v1282_v56 = vpop.f32.mrb[11].mxu1 }
 0x2f5   :  { %948 = vst.msk [vmem:[#allocation2] sm:$0xf] %vm947_vm2, %v944_v55 }
 0x2f6   :  { %1438 = shalt.err (!%p1435_p4)
}
 0x2f7   :  { %s1439_s24 = scalar_lea.hbm %s1965_s7, 64 }
 0x2f8   :  { %p1440_p5 = scmp.ne.s32.totalorder %s1965_s7, %s1439_s24  ;;  %p1443_p6 = scmp.lt.u32.totalorder %s1439_s24, %s1965_s7 }
 0x2fa   :  { %p1445_p7 = pnand %p1443_p6, %p1440_p5 }
 0x2fc   :  { %1448 = shalt.err (!%p1445_p7)
}
 0x2fd   :  { %958 = dma.vmem_to_hbm [thread:$0]  %s956_s21, 64, %s1965_s7, [#allocation3]  }
 0x2fe   :  { %1449 = dma.done.wait [#allocation3], 64  }
 0x2ff   :  { %1450 = vsyncadd [#allocation3], 4294967232 }
 0x300   :  { %962 = vsyncpa [#allocation3], 1 }

</bundles_post_ra>
